<compile_context>
chip_gen: v6e
topology: v6e:2x2x1
jax: 0.10.0
libtpu: 0.0.40
codegen_flags: <defaults>
</compile_context>

<pallas_src>
import functools

import jax
import jax.numpy as jnp
from jax.experimental import pallas as pl
from jax.experimental.pallas import tpu as pltpu


def _gat_kernel(atoms_ref, edges_ref, w_ref, a2_ref, out_ref, h_scr, *,
                alpha, bt, n, fout, unrolled):
    """One grid step = BT graphs, flattened to BT*N rows.

    atoms_ref : (BT*N, Fin)  bf16
    edges_ref : (BT*N, deg)  int32 neighbor indices
    w_ref     : (Fin, Fp)    bf16, column `fout` holds W @ a1 (folded)
    a2_ref    : (1, Fp)      bf16, a2 zero-padded to Fp lanes
    out_ref   : (BT*N, Fp)   f32  ELU(h'), padded columns sliced off outside
    h_scr     : (BT*N, Fp)   f32 VMEM scratch holding h (+ f1 in column fout)
    """
    deg = edges_ref.shape[1]
    fp = w_ref.shape[1]

    # --- one MXU matmul for the whole block: h, with f1 = h@a1 in col `fout`.
    h = jnp.dot(atoms_ref[...], w_ref[...], preferred_element_type=jnp.float32)
    h_scr[...] = h

    if unrolled:
        # One block-wide M=1 matvec: f2[j] = h_j . a2 for every node of every
        # graph, produced directly as a lane-dense row (static slices below).
        f2_all = jax.lax.dot_general(
            a2_ref[...], h.astype(jnp.bfloat16),
            (((1,), (1,)), ((), ())),
            preferred_element_type=jnp.float32)                # (1, BT*N) f32
        a2_rep = None
    else:
        f2_all = None
        # a2 broadcast to N rows, hoisted out of the per-graph loop.
        a2_rep = jnp.broadcast_to(a2_ref[...], (n, fp))        # (N, Fp) bf16

    col = jax.lax.broadcasted_iota(jnp.int32, (n, n), 1)       # neighbor idx j
    neg_big = jnp.float32(-9e15)

    # TODO(synk): for very large N, tile the neighbor dim with an online
    # softmax so the (N, N) f32 working set stays bounded (v7x 64 MiB VMEM).
    def one_graph(g):
        row0 = g * n
        if not isinstance(row0, int) and n % 8 == 0:
            row0 = pl.multiple_of(row0, 8)

        hg = h_scr[pl.ds(row0, n), :]                          # (N, Fp) f32
        hg_bf = hg.astype(jnp.bfloat16)
        f1 = hg[:, fout:fout + 1]                              # (N, 1) = h_i.a1

        if unrolled:
            f2_row = f2_all[:, g * n:(g + 1) * n]              # (1, N) = h_j.a2
            e = f1 + f2_row                                    # (N, N)
        else:
            # every row of a2_rep is a2  ->  e2[i, j] = h_j . a2
            e2 = jax.lax.dot_general(
                a2_rep, hg_bf, (((1,), (1,)), ((), ())),
                preferred_element_type=jnp.float32)            # (N, N)
            e = f1 + e2

        # LeakyReLU: max form saves a select (valid for 0 < alpha < 1).
        if 0.0 < alpha < 1.0:
            e = jnp.maximum(e, alpha * e)
        else:
            e = jnp.where(e > 0, e, alpha * e)

        # Adjacency rebuilt in-kernel from the integer edge list
        # (out-of-range indices never match -> "no edge").
        edges_g = edges_ref[pl.ds(row0, n), :]                 # (N, deg) int32
        adj = col == edges_g[:, 0:1]
        for d in range(1, deg):
            adj = jnp.logical_or(adj, col == edges_g[:, d:d + 1])
        e = jnp.where(adj, e, neg_big)

        # Row-wise softmax with deferred normalization (EUP reciprocal).
        m = jnp.max(e, axis=1, keepdims=True)
        p = jnp.exp(e - m)                                     # un-normalized
        l = jnp.sum(p, axis=1, keepdims=True)                  # (N, 1)

        hp = jnp.dot(p.astype(jnp.bfloat16), hg_bf,
                     preferred_element_type=jnp.float32)       # (N, Fp) f32
        hp = hp * pl.reciprocal(l, approx=True)

        # ELU; dead branch clamped so exp never sees large positives (no inf).
        out_ref[pl.ds(row0, n), :] = jnp.where(
            hp > 0, hp, jnp.exp(jnp.minimum(hp, 0.0)) - 1.0)

    if unrolled:
        for g in range(bt):
            one_graph(g)
    else:
        def body(g, carry):
            one_graph(g)
            return carry
        jax.lax.fori_loop(0, bt, body, 0, unroll=2)


def _pick_block_b(B, N, target_rows=512):
    """Graphs per grid step: divides B, keeps the flattened block sublane
    aligned, targets ~target_rows flattened MXU rows, and keeps the grid >= 2
    (preferably even) steps so v7x megacore can split it across TensorCores."""
    divs = [d for d in range(1, B + 1) if B % d == 0]
    ok = [d for d in divs if d == B or (d * N) % 8 == 0]
    cand = [d for d in ok if d * N <= max(target_rows, N)] or [min(ok)]
    bt = max(cand)
    if B // bt < 2:
        smaller = [d for d in ok if d < bt]
        if smaller:
            bt = max(smaller)
    if (B // bt) % 2 == 1:
        even = [d for d in ok if d <= bt and (B // d) % 2 == 0]
        if even:
            bt = max(even)
    return bt


def graph_attention(atoms, edges, W, a, alpha, *, block_b=None):
    """Pallas GraphAttention forward.

    atoms [B, N, Fin] float, edges [B, N, deg] int, W [Fin, Fout],
    a [2*Fout, 1]; returns [B, N, Fout] float32.
    """
    B, N, Fin = atoms.shape
    Fout = W.shape[1]
    deg = edges.shape[2]

    # Lane-dense / MXU-aligned width; one extra column holds the folded W@a1.
    Fp = ((Fout + 1 + 127) // 128) * 128

    BT = _pick_block_b(B, N) if block_b is None else block_b
    assert B % BT == 0, "block_b must divide the batch"
    rows = BT * N

    # Parameters: W augmented with the folded a1 column; a2 as a padded row.
    Wf = W.astype(jnp.float32)
    a1 = a[:Fout, :].astype(jnp.float32)                      # (Fout, 1)
    a2 = a[Fout:, :].astype(jnp.float32)                      # (Fout, 1)
    W_aug = jnp.zeros((Fin, Fp), jnp.float32)
    W_aug = W_aug.at[:, :Fout].set(Wf)
    W_aug = W_aug.at[:, Fout:Fout + 1].set(Wf @ a1)           # f1 = atoms@(W a1)
    W_aug = W_aug.astype(jnp.bfloat16)
    a2_row = jnp.zeros((1, Fp), jnp.float32).at[:, :Fout].set(a2.T)
    a2_row = a2_row.astype(jnp.bfloat16)

    # Wrapper-side flattening: contiguous DMAs, no in-kernel reshapes.
    atoms_flat = atoms.reshape(B * N, Fin).astype(jnp.bfloat16)
    # TODO(synk): edges could be stored int16/int8 in HBM to shrink this DMA.
    edges_flat = edges.reshape(B * N, deg).astype(jnp.int32)

    unrolled = BT <= 8
    kernel = functools.partial(_gat_kernel, alpha=float(alpha), bt=BT, n=N,
                               fout=Fout, unrolled=unrolled)

    out = pl.pallas_call(
        kernel,
        out_shape=jax.ShapeDtypeStruct((B * N, Fp), jnp.float32),
        grid=(B // BT,),
        in_specs=[
            pl.BlockSpec((rows, Fin), lambda b: (b, 0)),       # atoms  (bf16)
            pl.BlockSpec((rows, deg), lambda b: (b, 0)),       # edges  (int32)
            pl.BlockSpec((Fin, Fp), lambda b: (0, 0)),         # W_aug  (shared)
            pl.BlockSpec((1, Fp), lambda b: (0, 0)),           # a2 row (shared)
        ],
        out_specs=pl.BlockSpec((rows, Fp), lambda b: (b, 0)),
        scratch_shapes=[pltpu.VMEM((rows, Fp), jnp.float32)],
        compiler_params=pltpu.CompilerParams(
            dimension_semantics=("parallel",),
            vmem_limit_bytes=32 * 1024 * 1024),
    )(atoms_flat, edges_flat, W_aug, a2_row)

    # TODO(synk): downstream consumers could take the padded (B, N, Fp) slab
    # (or a bf16 output) directly and skip this XLA slice copy.
    return out.reshape(B, N, Fp)[..., :Fout]


def _reference(atoms, edges, W, a, alpha):
    """Pure-JAX f32 replica of the torch forward (loop over the batch)."""
    B, N, Fin = atoms.shape
    Fout = W.shape[1]
    outs = []
    for b in range(B):
        adj = jnp.zeros((N, N), jnp.float32).at[
            jnp.arange(N)[:, None], edges[b]].set(1.0)
        h = atoms[b] @ W
        a_input = jnp.concatenate(
            [jnp.repeat(h, N, axis=0), jnp.tile(h, (N, 1))], axis=1
        ).reshape(N, N, 2 * Fout)
        e = (a_input @ a)[..., 0]
        e = jnp.where(e > 0, e, alpha * e)
        e = jnp.where(adj > 0, e, jnp.float32(-9e15))
        attn = jax.nn.softmax(e, axis=1)
        hp = attn @ h
        outs.append(jnp.where(hp > 0, hp, jnp.expm1(hp)))
    return jnp.stack(outs, 0)


if __name__ == "__main__":
    alpha = 0.2
    key = jax.random.PRNGKey(0)

    def run_case(B, N, Fin, Fout, DEG, case_key):
        k_atom, k_edge, k_w, k_a = jax.random.split(case_key, 4)
        atoms = jax.random.normal(k_atom, (B, N, Fin), jnp.float32)
        edges = jax.random.randint(k_edge, (B, N, DEG), 0, N)
        # torch init is zeros -> trivial output; use small random params to
        # exercise the math.
        W = 0.1 * jax.random.normal(k_w, (Fin, Fout), jnp.float32)
        a = 0.1 * jax.random.normal(k_a, (2 * Fout, 1), jnp.float32)

        out = jax.block_until_ready(graph_attention(atoms, edges, W, a, alpha))
        ref = _reference(atoms, edges, W, a, alpha)
        assert out.shape == (B, N, Fout)
        # bf16 MXU operands + approx reciprocal -> relaxed tolerance vs f32 ref
        assert jnp.allclose(out, ref, atol=2e-2, rtol=2e-2), (
            f"mismatch vs reference for B={B}, N={N}")

    k1, k2 = jax.random.split(key)
    # small batch -> BT=1, grid=2 (statically unrolled per-graph path)
    run_case(2, 8, 16, 32, 3, k1)
    # larger batch -> BT=16, grid=2 (lax.fori_loop per-graph path)
    run_case(32, 8, 16, 32, 3, k2)

    print("KERNEL_OK")
</pallas_src>

<mosaic_0001>
module attributes {stable_mosaic.version = 11 : i64} {
  func.func @_gat_kernel(%arg0: i32, %arg1: memref<8x16xbf16, #tpu.memory_space<vmem>>, %arg2: memref<8x3xi32, #tpu.memory_space<vmem>>, %arg3: memref<16x128xbf16, #tpu.memory_space<vmem>>, %arg4: memref<1x128xbf16, #tpu.memory_space<vmem>>, %arg5: memref<8x128xf32, #tpu.memory_space<vmem>>, %arg6: memref<8x128xf32, #tpu.memory_space<vmem>>) attributes {dimension_semantics = [#tpu.dimension_semantics<parallel>], iteration_bounds = array<i64: 2>, scalar_prefetch = 0 : i64, scratch_operands = 1 : i64, tpu.core_type = #tpu.core_type<tc>, window_params = [{transform_indices = @transform_0, window_bounds = array<i64: 8, 16>}, {transform_indices = @transform_1, window_bounds = array<i64: 8, 3>}, {pipeline_mode = #tpu.pipeline_mode<synchronous>, transform_indices = @transform_2, window_bounds = array<i64: 16, 128>}, {pipeline_mode = #tpu.pipeline_mode<synchronous>, transform_indices = @transform_3, window_bounds = array<i64: 1, 128>}, {transform_indices = @transform_4, window_bounds = array<i64: 8, 128>}]} {
    %c0 = arith.constant 0 : index
    %c0_0 = arith.constant 0 : index
    %0 = vector.load %arg1[%c0, %c0_0] : memref<8x16xbf16, #tpu.memory_space<vmem>>, vector<8x16xbf16>
    %c0_1 = arith.constant 0 : index
    %c0_2 = arith.constant 0 : index
    %1 = vector.load %arg3[%c0_1, %c0_2] : memref<16x128xbf16, #tpu.memory_space<vmem>>, vector<16x128xbf16>
    %cst = arith.constant dense<0.000000e+00> : vector<8x128xf32>
    %2 = tpu.matmul %0, %1, %cst {dimension_numbers = #tpu.dot_dimension_numbers<[1], [0], [0], [1], [0, 0, 1, 1], [], []>} : vector<8x16xbf16>, vector<16x128xbf16>, vector<8x128xf32> -> vector<8x128xf32>
    %c0_3 = arith.constant 0 : index
    %c0_4 = arith.constant 0 : index
    %3 = vector.load %arg6[%c0_3, %c0_4] : memref<8x128xf32, #tpu.memory_space<vmem>>, vector<8x128xf32>
    tpu.vector_store %arg6[%c0_3, %c0_4], %2 {strides = array<i32>} : memref<8x128xf32, #tpu.memory_space<vmem>>, vector<8x128xf32>,
    %c0_5 = arith.constant 0 : index
    %c0_6 = arith.constant 0 : index
    %4 = vector.load %arg4[%c0_5, %c0_6] : memref<1x128xbf16, #tpu.memory_space<vmem>>, vector<1x128xbf16>
    %5 = arith.truncf %2 : vector<8x128xf32> to vector<8x128xbf16>
    %cst_7 = arith.constant dense<0.000000e+00> : vector<1x8xf32>
    %6 = tpu.matmul %4, %5, %cst_7 {dimension_numbers = #tpu.dot_dimension_numbers<[1], [1], [0], [0], [0, 0, 1, 0], [], []>} : vector<1x128xbf16>, vector<8x128xbf16>, vector<1x8xf32> -> vector<1x8xf32>
    %7 = tpu.iota {dimensions = array<i32: 1>} : vector<8x8xi32>
    %c0_8 = arith.constant 0 : index
    %c0_9 = arith.constant 0 : index
    %8 = vector.load %arg6[%c0_8, %c0_9] : memref<8x128xf32, #tpu.memory_space<vmem>>, vector<8x128xf32>
    %9 = arith.truncf %8 : vector<8x128xf32> to vector<8x128xbf16>
    %10 = vector.extract_strided_slice %8 {offsets = [0, 32], sizes = [8, 1], strides = [1, 1]} : vector<8x128xf32> to vector<8x1xf32>
    %11 = vector.broadcast %10 : vector<8x1xf32> to vector<8x8xf32>
    %12 = vector.broadcast %6 : vector<1x8xf32> to vector<8x8xf32>
    %13 = arith.addf %11, %12 : vector<8x8xf32>
    %cst_10 = arith.constant 2.000000e-01 : f32
    %14 = vector.broadcast %cst_10 : f32 to vector<8x8xf32>
    %15 = arith.mulf %14, %13 : vector<8x8xf32>
    %16 = arith.maximumf %13, %15 : vector<8x8xf32>
    %c0_11 = arith.constant 0 : index
    %c0_12 = arith.constant 0 : index
    %17 = vector.load %arg2[%c0_11, %c0_12] : memref<8x3xi32, #tpu.memory_space<vmem>>, vector<8x3xi32>
    %18 = vector.extract_strided_slice %17 {offsets = [0, 0], sizes = [8, 1], strides = [1, 1]} : vector<8x3xi32> to vector<8x1xi32>
    %19 = vector.broadcast %18 : vector<8x1xi32> to vector<8x8xi32>
    %20 = arith.cmpi eq, %7, %19 : vector<8x8xi32>
    %21 = vector.extract_strided_slice %17 {offsets = [0, 1], sizes = [8, 1], strides = [1, 1]} : vector<8x3xi32> to vector<8x1xi32>
    %22 = vector.broadcast %21 : vector<8x1xi32> to vector<8x8xi32>
    %23 = arith.cmpi eq, %7, %22 : vector<8x8xi32>
    %24 = arith.ori %20, %23 : vector<8x8xi1>
    %25 = vector.extract_strided_slice %17 {offsets = [0, 2], sizes = [8, 1], strides = [1, 1]} : vector<8x3xi32> to vector<8x1xi32>
    %26 = vector.broadcast %25 : vector<8x1xi32> to vector<8x8xi32>
    %27 = arith.cmpi eq, %7, %26 : vector<8x8xi32>
    %28 = arith.ori %24, %27 : vector<8x8xi1>
    %cst_13 = arith.constant -9.000000e+15 : f32
    %29 = vector.broadcast %cst_13 : f32 to vector<8x8xf32>
    %30 = arith.select %28, %16, %29 : vector<8x8xi1>, vector<8x8xf32>
    %cst_14 = arith.constant dense<0xFF800000> : vector<8xf32>
    %31 = vector.multi_reduction <maximumf>, %30, %cst_14 [1] : vector<8x8xf32> to vector<8xf32>
    %32 = vector.shape_cast %31 : vector<8xf32> to vector<8x1xf32>
    %33 = vector.broadcast %32 : vector<8x1xf32> to vector<8x8xf32>
    %34 = arith.subf %30, %33 : vector<8x8xf32>
    %35 = math.exp %34 : vector<8x8xf32>
    %cst_15 = arith.constant dense<0.000000e+00> : vector<8xf32>
    %36 = vector.multi_reduction <add>, %35, %cst_15 [1] : vector<8x8xf32> to vector<8xf32>
    %37 = vector.shape_cast %36 : vector<8xf32> to vector<8x1xf32>
    %38 = arith.truncf %35 : vector<8x8xf32> to vector<8x8xbf16>
    %cst_16 = arith.constant dense<0.000000e+00> : vector<8x128xf32>
    %39 = tpu.matmul %38, %9, %cst_16 {dimension_numbers = #tpu.dot_dimension_numbers<[1], [0], [0], [1], [0, 0, 1, 1], [], []>} : vector<8x8xbf16>, vector<8x128xbf16>, vector<8x128xf32> -> vector<8x128xf32>
    %40 = tpu.reciprocal %37 {approx = true} : vector<8x1xf32> -> vector<8x1xf32>
    %41 = vector.broadcast %40 : vector<8x1xf32> to vector<8x128xf32>
    %42 = arith.mulf %39, %41 : vector<8x128xf32>
    %cst_17 = arith.constant 0.000000e+00 : f32
    %43 = vector.broadcast %cst_17 : f32 to vector<8x128xf32>
    %44 = arith.cmpf ogt, %42, %43 : vector<8x128xf32>
    %cst_18 = arith.constant 0.000000e+00 : f32
    %45 = vector.broadcast %cst_18 : f32 to vector<8x128xf32>
    %46 = arith.minimumf %42, %45 : vector<8x128xf32>
    %47 = math.exp %46 : vector<8x128xf32>
    %cst_19 = arith.constant 1.000000e+00 : f32
    %48 = vector.broadcast %cst_19 : f32 to vector<8x128xf32>
    %49 = arith.subf %47, %48 : vector<8x128xf32>
    %50 = arith.select %44, %42, %49 : vector<8x128xi1>, vector<8x128xf32>
    %c0_20 = arith.constant 0 : index
    %c0_21 = arith.constant 0 : index
    %51 = vector.load %arg5[%c0_20, %c0_21] : memref<8x128xf32, #tpu.memory_space<vmem>>, vector<8x128xf32>
    tpu.vector_store %arg5[%c0_20, %c0_21], %50 {strides = array<i32>} : memref<8x128xf32, #tpu.memory_space<vmem>>, vector<8x128xf32>,
    return
  }
  func.func @transform_0(%arg0: i32) -> (i32, i32) {
    %c0_i32 = arith.constant 0 : i32
    %c0_i32_0 = arith.constant 0 : i32
    return %arg0, %c0_i32 : i32, i32
  }
  func.func @transform_1(%arg0: i32) -> (i32, i32) {
    %c0_i32 = arith.constant 0 : i32
    %c0_i32_0 = arith.constant 0 : i32
    return %arg0, %c0_i32 : i32, i32
  }
  func.func @transform_2(%arg0: i32) -> (i32, i32) {
    %c0_i32 = arith.constant 0 : i32
    %c0_i32_0 = arith.constant 0 : i32
    %c0_i32_1 = arith.constant 0 : i32
    return %c0_i32, %c0_i32_0 : i32, i32
  }
  func.func @transform_3(%arg0: i32) -> (i32, i32) {
    %c0_i32 = arith.constant 0 : i32
    %c0_i32_0 = arith.constant 0 : i32
    %c0_i32_1 = arith.constant 0 : i32
    return %c0_i32, %c0_i32_0 : i32, i32
  }
  func.func @transform_4(%arg0: i32) -> (i32, i32) {
    %c0_i32 = arith.constant 0 : i32
    %c0_i32_0 = arith.constant 0 : i32
    return %arg0, %c0_i32 : i32, i32
  }
}

</mosaic_0001>

<bundles_post_ra>
// kernel: tpu_custom_call.1
= control target key start
LH: loop header
LB: loop body
LE: loop exit
PB: predicated region body
PF: predicated region fallthrough
CT: control target
= control target key end

     0   :  { %9 = vsyncpa [#allocation4], 0  ;;  %s783_s0 = inlined_call_operand.vmem [shape: bf16[16,16], index: 0, kind: input, shape index: {}]   ;;  %s784_s1 = inlined_call_operand.vmem [shape: s32[16,3], index: 1, kind: input, shape index: {}]   ;;  %s785_s2 = inlined_call_operand.vmem [shape: bf16[16,128], index: 2, kind: input, shape index: {}]   ;;  %s786_s3 = inlined_call_operand.vmem [shape: bf16[1,128], index: 3, kind: input, shape index: {}]   ;;  %s787_s4 = inlined_call_operand.hbm [shape: f32[16,128], index: 4, kind: output, shape index: {}]  }
   0x1   :  { %11 = vsyncpa [#allocation4 + $0x1], 0  ;;  %s681_s15 = smov 0   ;;  %s683_s16 = smov 0  }
   0x2   :  { %s685_s17 = smov 0   ;;  %s687_s18 = smov 0  }
   0x3 LB: > { %s702_s19 = sadd.s32 4294967295, %s647_s18   ;;  %s491_s20 = sadd.s32 4294967294, %s647_s18   ;;  %s647_s18 = sphi %s687_s18, %s793_s18   ;;  %s643_s17 = sphi %s685_s17, %s792_s17   ;;  %s639_s16 = sphi %s683_s16, %s791_s16   ;;  %s635_s15 = sphi %s681_s15, %s790_s15  }
   0x4   : > { %s706_s21 = sadd.s32 1, %s647_s18   ;;  %s118_s22 = sadd.s32 1, %s643_s17 }
   0x5   : > { %s115_s23 = ssub.s32 %s647_s18, %s706_s21  ;;  %p128_p0 = scmp.ne.s32.totalorder %s643_s17, %s639_s16 }
   0x6   : > { %p116_p1 = scmp.eq.s32.totalorder %s115_s23, 0  ;;  %p129_p2 = scmp.eq.s32.totalorder %s702_s19, 1 }
   0x7   : > { %p134_p3 = scmp.ne.s32.totalorder %s639_s16, %s635_s15  ;;  %p135_p4 = scmp.eq.s32.totalorder %s491_s20, 1 }
   0x8   : > { %s717_s24 = scalar_select %p116_p1, %s643_s17, %s118_s22  }
   0x9   : > { %p719_p5 = por %p129_p2, %p128_p0  ;;  %p723_p6 = por %p135_p4, %p134_p3 }
   0xa   : > { %p494_p7 = scmp.ge.s32.totalorder %s647_s18, 1  ;;  %p173_p8 = scmp.lt.s32.totalorder %s647_s18, 3 }
   0xc   : > { %p174_p9 = pnand %p494_p7, %p173_p8 }
   0xd   : > { %p202_p10 = scmp.lt.s32.totalorder (!%p174_p9), %s702_s19, 1  ;;  %s199_s14 = sand.u32 (!%p174_p9), 1, %s639_s16  }
   0xe   : > { %177 = sbr.rel (%p174_p9) target bundleno = 816 (0x330), region = 36  ;;  %s495_s20 = sshll.u32 (!%p174_p9), %s199_s14, 3 }
   0xf   : > { %s503_s22 = sshll.u32 (!%p174_p9), %s702_s19, 7  ;;  %s201_s23 = scalar_lea.vmem (!%p174_p9), [#allocation3], %s495_s20 }
  0x10   : > { %s420_s27 = sshll.u32 (!%p174_p9), %s201_s23, 4  ;;  %s407_s5 = scalar_lea.sflag (!%p174_p9), [#allocation4], %s199_s14  ;;  %s421_s27 = int_to_ptr.vmem [resolvable:$true] %s420_s27 }
  0x11   : > { %s587_s6 = scalar_lea.vmem (!%p174_p9), %s421_s27, 128 }
  0x12   : > { %p588_p11 = scmp.ne.s32.totalorder (!%p174_p9), %s421_s27, %s587_s6 }
  0x13   : > { %v580_v0 = vld [vmem:[%s785_s2] sm:$0xff]   ;;  %v649_v1 = vmov 0.0   ;;  %vm650_vm0 = vmmov 0   ;;  %s203_s29 = scalar_select %p202_p10, %s702_s19, 1  ;;  %v651_v2 = vmov 32   ;;  %vm220_vm1 = vcmask 130048  }
  0x14   : > { %512 = vmatprep.subr.bf16.mxu0 %v649_v1  ;;  %518 = vmatprep.subr.bf16.mxu1 %v649_v1  ;;  %v652_v4 = vmov 1   ;;  %v653_v6 = vmov 2   ;;  %vm353_vm2 = vcmask 1043456   ;;  %v654_v12 = vmov 0   ;;  %v265_v14 = vld [vmem:[%s786_s3] sm:$0x1]  ;;  %p589_p12 = pnand %p588_p11, %p719_p5 }
  0x15   : > { %513 = vmatpush3.bf16.msra.mxu0 %v580_v0  ;;  %514 = vmatprep.mubr.msk.bf16.mxu0 %vm650_vm0, %v649_v1  ;;  %s496_s30 = sshll.u32 %s203_s29, 2  ;;  %s497_s8 = sshll.u32 %s203_s29, 3  ;;  %v307_v15 = vlaneseq  ;;  %vm339_vm7 = vcmask 64512  }
  0x16   : > { %575 = vset.pattern.permute.xlu0 %v651_v2  ;;  %524 = vmatprep.subr.bf16.mxu0 %v649_v1  ;;  %s205_s7 = scalar_lea.vmem %s783_s0, %s496_s30  ;;  %s209_s11 = scalar_lea.vmem %s784_s1, %s497_s8 }
  0x17   : > { %520 = vmatprep.mubr.msk.bf16.mxu1 %vm650_vm0, %v649_v1  ;;  %v211_v3 = vld [vmem:[%s205_s7] sm:$0xf]  ;;  %577 = vset.pattern.permute.xlu1 %v652_v4  ;;  %v317_v16 = vshrl.u32 %v307_v15, 7  ;;  %v308_v20 = vand.u32 127, %v307_v15  ;;  %s748_s30 = scalar_lea.hbm %s787_s4, %s503_s22  ;;  %p590_p13 = pneg %p589_p12 }
  0x18   : > { %515 = vmatmul.mubr.msk.bf16.vlgmr.msra.gmra.mxu0 %vm220_vm1, %v211_v3  ;;  %v323_v5 = vld [vmem:[%s209_s11] sm:$0xff]  ;;  %s655_s19 = smov [#allocation3]  }
  0x19   : > { %526 = vmatprep.mubr.msk.bf16.mxu0 %vm650_vm0, %v649_v1  ;;  %329 = vperm.xlu1 %577, %v323_v5   ;;  %v318_v19 = vsub.s32 0, %v317_v16  ;;  %s591_s7 = sshll.u32 %s655_s19, 4  ;;  %s592_s7 = int_to_ptr.vmem [resolvable:$false] %s591_s7 }
  0x1a   : > { %s593_s8 = scalar_lea.vmem %s592_s7, 256  ;;  %p594_p0 = scmp.lt.s32.totalorder %s421_s27, %s592_s7 }
  0x1b   : > { %p595_p1 = scmp.lt.s32.totalorder %s593_s8, %s587_s6 }
  0x1d   : > { %578 = vset.pattern.permute.xlu1 %v653_v6  ;;  %p596_p2 = por %p595_p1, %p594_p0 }
  0x1e   : > { %334 = vperm.xlu1 %578, %v323_v5  }
  0x1f   : > { %p597_p3 = pnand %p596_p2, %p590_p13 }
  0x94   : > { %v330_v18 = vpop.permute.xlu1 %329 }
  0x95   : > { %vm331_vm3 = vcmp.eq.s32.totalorder %v308_v20, %v330_v18 }
  0x99   : > { %v335_v24 = vpop.permute.xlu1 %334 }
  0x9a   : > { %vm336_vm6 = vcmp.eq.s32.totalorder %v308_v20, %v335_v24 }
  0xd8   : > { %v258_v7 = vpop.f32.mrf.mxu0 }
  0xd9   : > { %313 = vperm.xlu0 %575, %v258_v7   ;;  %v266_v8 = vpack.c.bf16 %v258_v7, %v258_v7 }
  0xda   : > { %v516_v9 = vpop.f32.mrf.mxu0 }
  0xdb   : > { %519 = vmatpush3.bf16.xpose.msra.mxu1 %v266_v8  ;;  %v355_v10 = vsel %vm353_vm2, %v266_v8, 0 }
  0xdc   : > { %v261_v11 = vpop.f32.mrf.mxu0  ;;  %525 = vmatpush3.bf16.msra.mxu0 %v355_v10 }
  0xdd   : > { %576 = vset.pattern.permute.xlu0 %v654_v12 }
  0xde   : > { %v517_v13 = vpop.f32.mrf.mxu0  ;;  %325 = vperm.xlu0 %576, %v323_v5  }
  0xe2   : > { %521 = vmatmul.mubr.bf16.vlgmr.msra.gmra.mxu1 %v265_v14  ;;  %579 = vset.pattern.permute.xlu0 %v653_v6 }
 0x154   : > { %v314_v17 = vpop.permute.xlu0 %313 }
 0x159   : > { %v326_v21 = vpop.permute.xlu0 %325 }
 0x15a   : > { %vm327_vm4 = vcmp.eq.s32.totalorder %v308_v20, %v326_v21 }
 0x15b   : > { %vm332_vm5 = vmor %vm327_vm4, %vm331_vm3 }
 0x15c   : > { %vm337_vm8 = vmor %vm332_vm5, %vm336_vm6 }
 0x1a2   : > { %v301_v22 = vpop.f32.mrf.mxu1 }
 0x1a3   : > { %v319_v23 = vrot.slane %v301_v22, %v318_v19 }
 0x1a4   : > { %v522_v25 = vpop.f32.mrf.mxu1 }
 0x1a5   : > { %v320_v26 = vadd.f32 %v319_v23, %v314_v17 }
 0x1a6   : > { %v304_v27 = vpop.f32.mrf.mxu1 }
 0x1a7   : > { %v321_v28 = vmul.f32 0.2, %v320_v26 }
 0x1a8   : > { %v523_v29 = vpop.f32.mrf.mxu1 }
 0x1a9   : > { %v322_v30 = vmax.f32 %v320_v26, %v321_v28 }
 0x1ab   : > { %v338_v31 = vsel %vm337_vm8, %v322_v30, -9e+15 }
 0x1ac   : > { %v340_v32 = vsel %vm339_vm7, %v338_v31, -inf }
 0x1ad   : > { %341 = vmax.xlane.f32.xlu1 %v340_v32 }
 0x236   : > { %v342_v33 = vpop.xlane.xlu1 %341 }
 0x237   : > { %v343_v34 = vsub.f32 %v338_v31, %v342_v33 }
 0x239   : > { %v344_v35 = vmul.f32 1.442695, %v343_v34 }
 0x23b   : > { %581 = vpow2.f32 %v344_v35 }
 0x248   : > { %v582_v36 = vpop.eup %581 }
 0x249   : > { %v346_v37 = vsel %vm339_vm7, %v582_v36, 0.0  ;;  %v349_v38 = vpack.c.bf16 %v582_v36, %v582_v36 }
 0x24a   : > { %347 = vadd.xlane.f32.xlu0 %v346_v37 }
 0x24b   : > { %527 = vmatmul.mubr.msk.bf16.vlgmr.msra.gmra.mxu0 %vm339_vm7, %v349_v38 }
 0x2d3   : > { %v348_v39 = vpop.xlane.xlu0 %347 }
 0x2d4   : > { %583 = vrcp.f32 %v348_v39 }
 0x2e1   : > { %v584_v40 = vpop.eup %583 }
 0x30b   : > { %v391_v41 = vpop.f32.mrf.mxu0 }
 0x30c   : > { %v398_v42 = vmul.f32 %v584_v40, %v391_v41 }
 0x30d   : > { %v528_v43 = vpop.f32.mrf.mxu0 }
 0x30e   : > { %v400_v44 = vmin.f32 %v398_v42, 0.0  ;;  %vm399_vm9 = vcmp.gt.f32.partialorder %v398_v42, 0.0 }
 0x30f   : > { %v394_v45 = vpop.f32.mrf.mxu0 }
 0x310   : > { %v401_v46 = vmul.f32 1.442695, %v400_v44 }
 0x311   : > { %v529_v47 = vpop.f32.mrf.mxu0 }
 0x312   : > { %585 = vpow2.f32 %v401_v46 }
 0x31f   : > { %v586_v48 = vpop.eup %585 }
 0x320   : > { %v501_v49 = vadd.f32 -1.0, %v586_v48 }
 0x322   : > { %v404_v50 = vsel %vm399_vm9, %v398_v42, %v501_v49 }
 0x323   : > { %405 = vst [vmem:[%s201_s23] sm:$0xff] %v404_v50 }
 0x324   : > { %600 = shalt.err (!%p597_p3)
}
 0x325   : > { %s601_s9 = scalar_lea.hbm %s748_s30, 128  ;;  %s605_s12 = scalar_lea.hbm %s787_s4, 256 }
 0x326   : > { %p602_p4 = scmp.ne.s32.totalorder %s748_s30, %s601_s9  ;;  %p606_p9 = scmp.lt.s32.totalorder %s748_s30, %s787_s4 }
 0x327   : > { %p607_p10 = scmp.lt.s32.totalorder %s605_s12, %s601_s9 }
 0x328   : > { %p603_p7 = pnand %p602_p4, %p719_p5 }
 0x329   : > { %p608_p11 = por %p607_p10, %p606_p9 }
 0x32a   : > { %p604_p8 = pneg %p603_p7 }
 0x32c   : > { %p609_p12 = pnand %p608_p11, %p604_p8 }
 0x32e   : > { %612 = shalt.err (!%p609_p12)
}
 0x32f   : > { %530 = dma.vmem_to_hbm [thread:$0]  (%p719_p5), %s421_s27, 128, %s748_s30, %s407_s5  }
 0x330 PF: > { %p536_p13 = scmp.ge.s32.totalorder %s647_s18, 2  ;;  %s432_s20 = sand.u32 1, %s635_s15  }
 0x331   : > { %s433_s22 = scalar_lea.sflag [#allocation4], %s432_s20 }
 0x332   : > { %p533_p0 = pnand %p536_p13, %p723_p6 }
 0x334   : > { %p534_p1 = pneg %p533_p0 }
 0x336   : > { %630 = dma.done.wait (%p534_p1), %s433_s22, 128  }
 0x337   : > { %632 = vsyncadd (%p534_p1), %s433_s22, 4294967168  ;;  %p14_p2 = scmp.ge.s32.totalorder %s706_s21, 4   ;;  %s790_s15 = smov %s639_s16 }
 0x338   : > { %s791_s16 = smov %s643_s17  ;;  %s792_s17 = smov %s717_s24 }
 0x339   : > { %s793_s18 = smov %s706_s21  ;;  %16 = sbr.rel (!%p14_p2) target bundleno = 3 (0x3), region = 74 }
 0x33e   :  { %438 = vsyncpa [#allocation4], 1 }
 0x33f   :  { %440 = vsyncpa [#allocation4 + $0x1], 1 }

</bundles_post_ra>
